<compile_context>
chip_gen: v7x
topology: tpu7x:2x2x1
jax: 0.10.0
libtpu: 0.0.40
codegen_flags: <defaults>
</compile_context>

<pallas_src>
import functools

import jax
import jax.numpy as jnp
from jax.experimental import pallas as pl
from jax.experimental.pallas import tpu as pltpu

HIDDEN1 = 32
HIDDEN2 = 64
HEAD_SUBLANE = 8            # fused head rows padded to a sublane multiple
BATCH_ALIGN = 128           # batch tile multiple -> lane-dense transposed output
MAX_TILE_B = 2048           # per perf review: 1K-2K tiles amortize per-step overhead
COMPUTE_DTYPE = jnp.bfloat16


def _cdiv(a, b):
    return -(-a // b)


def _round_up(x, m):
    return _cdiv(x, m) * m


def _choose_tiling(batch, max_tile_b=MAX_TILE_B):
    """Pick (n_tiles, tile_b): tile_b is a multiple of 128, <= max_tile_b,
    padding bounded by ~2*128 rows, and >=2 grid steps when B >= 256 so both
    v7x TensorCores get work under dimension_semantics=("parallel",)."""
    b = max(int(batch), 1)
    n_tiles = _cdiv(b, max_tile_b)
    if n_tiles == 1 and b >= 2 * BATCH_ALIGN:
        n_tiles = 2
    tile_b = _round_up(_cdiv(b, n_tiles), BATCH_ALIGN)
    return n_tiles, tile_b


def _actor_critic_kernel(
    x_ref,    # (tile_b, obs)        bf16
    w1_ref,   # (obs, 32)            bf16
    b1_ref,   # (1, 32)              f32
    w2_ref,   # (32, 64)             bf16
    b2_ref,   # (1, 64)              f32
    wh_ref,   # (HEAD_PAD, 64)       f32   rows: [policy^T | value^T | zero pad]
    bh_ref,   # (HEAD_PAD, 1)        f32
    out_ref,  # (HEAD_PAD, tile_b)   f32   transposed fused head output
):
    x = x_ref[...]

    # Encoder layer 1: bf16 MXU matmul, f32 accumulate, f32 bias + ReLU.
    h1 = jnp.dot(x, w1_ref[...], preferred_element_type=jnp.float32) + b1_ref[...]
    h1 = jnp.maximum(h1, 0.0)

    # Encoder layer 2.
    h2 = jnp.dot(h1.astype(w2_ref.dtype), w2_ref[...],
                 preferred_element_type=jnp.float32) + b2_ref[...]
    h2 = jnp.maximum(h2, 0.0)

    # Fused policy + value head, emitted transposed:
    #   (HEAD_PAD, 64) x (tile_b, 64)^T -> (HEAD_PAD, tile_b), lane dim = batch.
    # Head weights stay f32 for critic fidelity; cost is negligible (mem-bound).
    out_t = jax.lax.dot_general(
        wh_ref[...], h2,
        dimension_numbers=(((1,), (1,)), ((), ())),
        preferred_element_type=jnp.float32,
    ) + bh_ref[...]
    out_ref[...] = out_t.astype(out_ref.dtype)


def prepare_params(params):
    """Fuse policy/value heads into a transposed (HEAD_PAD, 64) slab (f32),
    cast the encoder weights (MXU operands) to bf16."""
    A = params["wp"].shape[1]
    head_pad = _round_up(A + 1, HEAD_SUBLANE)

    wh_t = jnp.zeros((head_pad, HIDDEN2), jnp.float32)
    wh_t = wh_t.at[:A, :].set(params["wp"].T).at[A, :].set(params["wv"][:, 0])
    bh_t = jnp.zeros((head_pad, 1), jnp.float32)
    bh_t = bh_t.at[:A, 0].set(params["bp"][0]).at[A, 0].set(params["bv"][0, 0])

    return {
        "w1": params["w1"].astype(COMPUTE_DTYPE),
        "b1": params["b1"].astype(jnp.float32),
        "w2": params["w2"].astype(COMPUTE_DTYPE),
        "b2": params["b2"].astype(jnp.float32),
        "wh": wh_t,   # f32: keeps value (critic) column at full weight precision
        "bh": bh_t,   # f32
    }


@functools.partial(jax.jit, static_argnames=("action_shape", "max_tile_b"))
def actor_critic_forward(local_obs, prepared, *, action_shape, max_tile_b=MAX_TILE_B):
    """Returns {'logit': (B, A), 'value': (B, 1)} matching the PyTorch forward."""
    B, obs_dim = local_obs.shape
    head_pad = prepared["wh"].shape[0]

    n_tiles, tile_b = _choose_tiling(B, max_tile_b)
    padded_b = n_tiles * tile_b

    x = local_obs.astype(COMPUTE_DTYPE)
    if padded_b != B:
        # Padding is bounded (<= ~255 rows) by the tiling heuristic; the cast
        # and pad fuse into a single XLA pass over x.
        x = jnp.pad(x, ((0, padded_b - B), (0, 0)))

    const = lambda i: (0, 0)  # weights/biases: same block every step -> VMEM-resident

    out_t = pl.pallas_call(
        _actor_critic_kernel,
        out_shape=jax.ShapeDtypeStruct((head_pad, padded_b), jnp.float32),
        grid_spec=pltpu.PrefetchScalarGridSpec(
            num_scalar_prefetch=0,
            grid=(n_tiles,),
            in_specs=[
                pl.BlockSpec((tile_b, obs_dim), lambda i: (i, 0)),
                pl.BlockSpec((obs_dim, HIDDEN1), const),
                pl.BlockSpec((1, HIDDEN1), const),
                pl.BlockSpec((HIDDEN1, HIDDEN2), const),
                pl.BlockSpec((1, HIDDEN2), const),
                pl.BlockSpec((head_pad, HIDDEN2), const),
                pl.BlockSpec((head_pad, 1), const),
            ],
            out_specs=pl.BlockSpec((head_pad, tile_b), lambda i: (0, i)),
        ),
        compiler_params=pltpu.CompilerParams(
            dimension_semantics=("parallel",),
        ),
    )(x, prepared["w1"], prepared["b1"], prepared["w2"], prepared["b2"],
      prepared["wh"], prepared["bh"])

    logit = out_t[:action_shape, :B].T
    value = out_t[action_shape:action_shape + 1, :B].T
    return {"logit": logit, "value": value}


def init_params(key, obs_shape, action_shape):
    """Deterministic init mimicking PyTorch nn.Linear (uniform +/- 1/sqrt(fan_in)),
    weights stored [in_features, out_features] so y = x @ W + b."""
    def linear(key, fan_in, fan_out):
        kw, kb = jax.random.split(key)
        bound = 1.0 / jnp.sqrt(float(fan_in))
        w = jax.random.uniform(kw, (fan_in, fan_out), jnp.float32, -bound, bound)
        b = jax.random.uniform(kb, (1, fan_out), jnp.float32, -bound, bound)
        return w, b

    k1, k2, k3, k4 = jax.random.split(key, 4)
    w1, b1 = linear(k1, obs_shape, HIDDEN1)
    w2, b2 = linear(k2, HIDDEN1, HIDDEN2)
    wp, bp = linear(k3, HIDDEN2, action_shape)
    wv, bv = linear(k4, HIDDEN2, 1)
    return {"w1": w1, "b1": b1, "w2": w2, "b2": b2,
            "wp": wp, "bp": bp, "wv": wv, "bv": bv}


def _reference_forward_mirrored(local_obs, params):
    """Pure-JAX reference mirroring the kernel's dtype choices
    (bf16 encoder operands, f32 accumulate/elementwise, f32 head)."""
    f32 = jnp.float32
    bf = lambda a: a.astype(COMPUTE_DTYPE).astype(f32)
    x = bf(local_obs)
    h1 = jnp.maximum(x @ bf(params["w1"]) + params["b1"], 0.0)
    h2 = jnp.maximum(bf(h1) @ bf(params["w2"]) + params["b2"], 0.0)
    logit = h2 @ params["wp"] + params["bp"]
    value = h2 @ params["wv"] + params["bv"]
    return {"logit": logit, "value": value}


def _reference_forward_f32(local_obs, params):
    """Pure-f32 reference matching the PyTorch ActorCriticNetwork (parity check)."""
    h1 = jnp.maximum(local_obs @ params["w1"] + params["b1"], 0.0)
    h2 = jnp.maximum(h1 @ params["w2"] + params["b2"], 0.0)
    return {"logit": h2 @ params["wp"] + params["bp"],
            "value": h2 @ params["wv"] + params["bv"]}


def _check(local_obs, params, prepared, action_shape):
    B = local_obs.shape[0]
    out = actor_critic_forward(local_obs, prepared, action_shape=action_shape)
    jax.block_until_ready(out)
    assert out["logit"].shape == (B, action_shape)
    assert out["value"].shape == (B, 1)

    ref = _reference_forward_mirrored(local_obs, params)
    assert jnp.allclose(out["logit"], ref["logit"], atol=2e-3, rtol=2e-3)
    assert jnp.allclose(out["value"], ref["value"], atol=2e-3, rtol=2e-3)

    ref32 = _reference_forward_f32(local_obs, params)  # PyTorch parity, looser tol
    assert jnp.allclose(out["logit"], ref32["logit"], atol=5e-2, rtol=5e-2)
    assert jnp.allclose(out["value"], ref32["value"], atol=5e-2, rtol=5e-2)


if __name__ == "__main__":
    obs_shape = 16
    action_shape = 6

    key = jax.random.PRNGKey(0)
    k_obs_small, k_obs_big, k_params = jax.random.split(key, 3)
    params = init_params(k_params, obs_shape, action_shape)
    prepared = prepare_params(params)

    # Small batch (single tile).
    local_obs = jax.random.normal(k_obs_small, (8, obs_shape), jnp.float32)
    _check(local_obs, params, prepared, action_shape)

    # Odd batch >= 256: exercises the 2-step "parallel" grid and padding path.
    local_obs_big = jax.random.normal(k_obs_big, (300, obs_shape), jnp.float32)
    _check(local_obs_big, params, prepared, action_shape)

    print("KERNEL_OK")
</pallas_src>

<mosaic_0001>
module attributes {stable_mosaic.version = 11 : i64} {
  func.func @_actor_critic_kernel(%arg0: i32, %arg1: memref<128x16xbf16, #tpu.memory_space<vmem>>, %arg2: memref<16x32xbf16, #tpu.memory_space<vmem>>, %arg3: memref<1x32xf32, #tpu.memory_space<vmem>>, %arg4: memref<32x64xbf16, #tpu.memory_space<vmem>>, %arg5: memref<1x64xf32, #tpu.memory_space<vmem>>, %arg6: memref<8x64xf32, #tpu.memory_space<vmem>>, %arg7: memref<8x1xf32, #tpu.memory_space<vmem>>, %arg8: memref<8x128xf32, #tpu.memory_space<vmem>>) attributes {dimension_semantics = [#tpu.dimension_semantics<parallel>], iteration_bounds = array<i64: 1>, scalar_prefetch = 0 : i64, scratch_operands = 0 : i64, tpu.core_type = #tpu.core_type<tc>, window_params = [{transform_indices = @transform_0, window_bounds = array<i64: 128, 16>}, {pipeline_mode = #tpu.pipeline_mode<synchronous>, transform_indices = @transform_1, window_bounds = array<i64: 16, 32>}, {pipeline_mode = #tpu.pipeline_mode<synchronous>, transform_indices = @transform_2, window_bounds = array<i64: 1, 32>}, {pipeline_mode = #tpu.pipeline_mode<synchronous>, transform_indices = @transform_3, window_bounds = array<i64: 32, 64>}, {pipeline_mode = #tpu.pipeline_mode<synchronous>, transform_indices = @transform_4, window_bounds = array<i64: 1, 64>}, {pipeline_mode = #tpu.pipeline_mode<synchronous>, transform_indices = @transform_5, window_bounds = array<i64: 8, 64>}, {pipeline_mode = #tpu.pipeline_mode<synchronous>, transform_indices = @transform_6, window_bounds = array<i64: 8, 1>}, {transform_indices = @transform_7, window_bounds = array<i64: 8, 128>}]} {
    %c0 = arith.constant 0 : index
    %c0_0 = arith.constant 0 : index
    %0 = vector.load %arg1[%c0, %c0_0] : memref<128x16xbf16, #tpu.memory_space<vmem>>, vector<128x16xbf16>
    %c0_1 = arith.constant 0 : index
    %c0_2 = arith.constant 0 : index
    %1 = vector.load %arg2[%c0_1, %c0_2] : memref<16x32xbf16, #tpu.memory_space<vmem>>, vector<16x32xbf16>
    %cst = arith.constant dense<0.000000e+00> : vector<128x32xf32>
    %2 = tpu.matmul %0, %1, %cst {dimension_numbers = #tpu.dot_dimension_numbers<[1], [0], [0], [1], [0, 0, 1, 1], [], []>} : vector<128x16xbf16>, vector<16x32xbf16>, vector<128x32xf32> -> vector<128x32xf32>
    %c0_3 = arith.constant 0 : index
    %c0_4 = arith.constant 0 : index
    %3 = vector.load %arg3[%c0_3, %c0_4] : memref<1x32xf32, #tpu.memory_space<vmem>>, vector<1x32xf32>
    %4 = vector.broadcast %3 : vector<1x32xf32> to vector<128x32xf32>
    %5 = arith.addf %2, %4 : vector<128x32xf32>
    %cst_5 = arith.constant 0.000000e+00 : f32
    %6 = vector.broadcast %cst_5 : f32 to vector<128x32xf32>
    %7 = arith.maximumf %5, %6 : vector<128x32xf32>
    %8 = arith.truncf %7 : vector<128x32xf32> to vector<128x32xbf16>
    %c0_6 = arith.constant 0 : index
    %c0_7 = arith.constant 0 : index
    %9 = vector.load %arg4[%c0_6, %c0_7] : memref<32x64xbf16, #tpu.memory_space<vmem>>, vector<32x64xbf16>
    %cst_8 = arith.constant dense<0.000000e+00> : vector<128x64xf32>
    %10 = tpu.matmul %8, %9, %cst_8 {dimension_numbers = #tpu.dot_dimension_numbers<[1], [0], [0], [1], [0, 0, 1, 1], [], []>} : vector<128x32xbf16>, vector<32x64xbf16>, vector<128x64xf32> -> vector<128x64xf32>
    %c0_9 = arith.constant 0 : index
    %c0_10 = arith.constant 0 : index
    %11 = vector.load %arg5[%c0_9, %c0_10] : memref<1x64xf32, #tpu.memory_space<vmem>>, vector<1x64xf32>
    %12 = vector.broadcast %11 : vector<1x64xf32> to vector<128x64xf32>
    %13 = arith.addf %10, %12 : vector<128x64xf32>
    %cst_11 = arith.constant 0.000000e+00 : f32
    %14 = vector.broadcast %cst_11 : f32 to vector<128x64xf32>
    %15 = arith.maximumf %13, %14 : vector<128x64xf32>
    %c0_12 = arith.constant 0 : index
    %c0_13 = arith.constant 0 : index
    %16 = vector.load %arg6[%c0_12, %c0_13] : memref<8x64xf32, #tpu.memory_space<vmem>>, vector<8x64xf32>
    %cst_14 = arith.constant dense<0.000000e+00> : vector<8x128xf32>
    %17 = tpu.matmul %16, %15, %cst_14 {dimension_numbers = #tpu.dot_dimension_numbers<[1], [1], [0], [0], [0, 0, 1, 0], [], []>} : vector<8x64xf32>, vector<128x64xf32>, vector<8x128xf32> -> vector<8x128xf32>
    %c0_15 = arith.constant 0 : index
    %c0_16 = arith.constant 0 : index
    %18 = vector.load %arg7[%c0_15, %c0_16] : memref<8x1xf32, #tpu.memory_space<vmem>>, vector<8x1xf32>
    %19 = vector.broadcast %18 : vector<8x1xf32> to vector<8x128xf32>
    %20 = arith.addf %17, %19 : vector<8x128xf32>
    %c0_17 = arith.constant 0 : index
    %c0_18 = arith.constant 0 : index
    %21 = vector.load %arg8[%c0_17, %c0_18] : memref<8x128xf32, #tpu.memory_space<vmem>>, vector<8x128xf32>
    tpu.vector_store %arg8[%c0_17, %c0_18], %20 {strides = array<i32>} : memref<8x128xf32, #tpu.memory_space<vmem>>, vector<8x128xf32>,
    return
  }
  func.func @transform_0(%arg0: i32) -> (i32, i32) {
    %c0_i32 = arith.constant 0 : i32
    %c0_i32_0 = arith.constant 0 : i32
    return %arg0, %c0_i32 : i32, i32
  }
  func.func @transform_1(%arg0: i32) -> (i32, i32) {
    %c0_i32 = arith.constant 0 : i32
    %c0_i32_0 = arith.constant 0 : i32
    %c0_i32_1 = arith.constant 0 : i32
    return %c0_i32, %c0_i32_0 : i32, i32
  }
  func.func @transform_2(%arg0: i32) -> (i32, i32) {
    %c0_i32 = arith.constant 0 : i32
    %c0_i32_0 = arith.constant 0 : i32
    %c0_i32_1 = arith.constant 0 : i32
    return %c0_i32, %c0_i32_0 : i32, i32
  }
  func.func @transform_3(%arg0: i32) -> (i32, i32) {
    %c0_i32 = arith.constant 0 : i32
    %c0_i32_0 = arith.constant 0 : i32
    %c0_i32_1 = arith.constant 0 : i32
    return %c0_i32, %c0_i32_0 : i32, i32
  }
  func.func @transform_4(%arg0: i32) -> (i32, i32) {
    %c0_i32 = arith.constant 0 : i32
    %c0_i32_0 = arith.constant 0 : i32
    %c0_i32_1 = arith.constant 0 : i32
    return %c0_i32, %c0_i32_0 : i32, i32
  }
  func.func @transform_5(%arg0: i32) -> (i32, i32) {
    %c0_i32 = arith.constant 0 : i32
    %c0_i32_0 = arith.constant 0 : i32
    %c0_i32_1 = arith.constant 0 : i32
    return %c0_i32, %c0_i32_0 : i32, i32
  }
  func.func @transform_6(%arg0: i32) -> (i32, i32) {
    %c0_i32 = arith.constant 0 : i32
    %c0_i32_0 = arith.constant 0 : i32
    %c0_i32_1 = arith.constant 0 : i32
    return %c0_i32, %c0_i32_0 : i32, i32
  }
  func.func @transform_7(%arg0: i32) -> (i32, i32) {
    %c0_i32 = arith.constant 0 : i32
    %c0_i32_0 = arith.constant 0 : i32
    return %c0_i32, %arg0 : i32, i32
  }
}

</mosaic_0001>

<bundles_post_ra>
// kernel: actor_critic_forward.1
= control target key start
LH: loop header
LB: loop body
LE: loop exit
PB: predicated region body
PF: predicated region fallthrough
CT: control target
= control target key end

     0   :  { %vm98_vm0 = vcmask 130048   ;;  %vm267_vm1 = vcmask 261120   ;;  %vm743_vm2 = vmmov 0   ;;  %vm412_vm3 = vcmask 523264   ;;  %s881_s1 = inlined_call_operand.vmem [shape: bf16[16,32], index: 1, kind: input, shape index: {}]   ;;  %s882_s0 = inlined_call_operand.vmem [shape: bf16[128,16], index: 0, kind: input, shape index: {}]   ;;  %s883_s3 = inlined_call_operand.vmem [shape: bf16[32,64], index: 3, kind: input, shape index: {}]   ;;  %s884_s2 = inlined_call_operand.vmem [shape: f32[1,32], index: 2, kind: input, shape index: {}]   ;;  %s885_s6 = inlined_call_operand.vmem [shape: f32[8,1], index: 6, kind: input, shape index: {}]   ;;  %s886_s4 = inlined_call_operand.vmem [shape: f32[1,64], index: 4, kind: input, shape index: {}]   ;;  %s887_s5 = inlined_call_operand.vmem [shape: f32[8,64], index: 5, kind: input, shape index: {}]   ;;  %s888_s7 = inlined_call_operand.vmem [shape: f32[8,128], index: 7, kind: output, shape index: {}]  }
   0x1   :  { %v731_v0 = vld [vmem:[%s881_s1] sm:$0xff]   ;;  %v733_v2 = vld [vmem:[%s882_s0 + $0x8] sm:$0xff]   ;;  %v734_v3 = vld [vmem:[%s882_s0 + $0x10] sm:$0xff]  }
   0x2   :  { %v732_v1 = vld [vmem:[%s882_s0] sm:$0xff]   ;;  %621 = vmatprep.subr.bf16.mxu1 %v731_v0  ;;  %v735_v4 = vld [vmem:[%s882_s0 + $0x18] sm:$0xff]   ;;  %v741_v6 = vld [vmem:[%s883_s3 + $0x8] sm:$0xff]  }
   0x3   :  { %622 = vmatpush3.bf16.msra.mxu1 %v731_v0  ;;  %623 = vmatprep.mubr.msk.bf16.mxu1 %vm98_vm0, %v732_v1  ;;  %v740_v5 = vld [vmem:[%s883_s3] sm:$0xff]   ;;  %v737_v8 = vld [vmem:[%s882_s0 + $0x28] sm:$0xff]   ;;  %v738_v9 = vld [vmem:[%s882_s0 + $0x30] sm:$0xff]  }
   0x4   :  { %v736_v7 = vld [vmem:[%s882_s0 + $0x20] sm:$0xff]   ;;  %639 = vmatprep.subr.bf16.mxu1 %v740_v5  ;;  %v739_v10 = vld [vmem:[%s882_s0 + $0x38] sm:$0xff]   ;;  %vm847_vm4 = vmpackc.low %vm412_vm3, %vm412_vm3 }
   0x5   :  { %v539_v11 = vld [vmem:[%s884_s2] ss:$0 sm:$0xff] }
   0x6   :  { %624 = vmatmul.mubr.msk.bf16.vlgmr.msra.gmra.mrb[0].mxu1 %vm98_vm0, %v733_v2 }
   0x7   :  { %627 = vmatprep.mubr.msk.bf16.mxu1 %vm98_vm0, %v734_v3  ;;  %640 = vmatpush3.bf16.msra.mxu1 %v740_v5  ;;  %v744_v5 = vmov 0.0  }
   0x8   :  { %641 = vmatprep.subr.bf16.mxu1 %v741_v6  ;;  %691 = vmatprep.mubr.msk.f32.mxu0 %vm743_vm2, %v744_v5 }
   0xb   :  { %642 = vmatpush3.bf16.msra.mxu1 %v741_v6  ;;  %v745_v6 = vmov 0  }
   0xc   :  { %730 = vset.pattern.permute.xlu0 %v745_v6 }
   0xe   :  { %628 = vmatmul.mubr.msk.bf16.gmra.mrb[4].mxu1 %vm98_vm0, %v735_v4  ;;  %v742_v4 = vmov 0.0|0.0  }
   0xf   :  { %631 = vmatprep.mubr.msk.bf16.mxu1 %vm98_vm0, %v736_v7  ;;  %694 = vmatprep.subr.bf16.mxu0 %v742_v4  ;;  %v406_v7 = vld [vmem:[%s885_s6] sm:$0xff] }
  0x10   :  { %409 = vperm.xlu0 %730, %v406_v7  }
  0x16   :  { %632 = vmatmul.mubr.msk.bf16.gmra.mrb[8].mxu1 %vm98_vm0, %v737_v8  ;;  %v557_v8 = vld [vmem:[%s886_s4] ss:$0 sm:$0xff] }
  0x17   :  { %635 = vmatprep.mubr.msk.bf16.mxu1 %vm98_vm0, %v738_v9 }
  0x1e   :  { %636 = vmatmul.mubr.msk.bf16.gmra.mrb[12].mxu1 %vm98_vm0, %v739_v10 }
  0xd9   :  { %v625_v12 = vpop.f32.mrb[0].mxu1 }
  0xda   :  { %v166_v13 = vadd.f32 %v625_v12, %v539_v11  ;;  %v157_v14 = vpop.f32.mrb[1].mxu1 }
  0xdb   :  { %v158_v15 = vadd.f32 %v539_v11, %v157_v14  ;;  %v626_v16 = vpop.f32.mrb[2].mxu1 }
  0xdc   :  { %v169_v17 = vadd.f32 %v626_v16, %v539_v11  ;;  %v160_v18 = vpop.f32.mrb[3].mxu1  ;;  %v222_v20 = vmax.f32 %v166_v13, 0.0 }
  0xdd   :  { %v161_v19 = vadd.f32 %v539_v11, %v160_v18  ;;  %v220_v22 = vmax.f32 %v158_v15, 0.0 }
  0xde   :  { %v223_v21 = vmax.f32 %v169_v17, 0.0 }
  0xdf   :  { %v221_v23 = vmax.f32 %v161_v19, 0.0 }
  0xe0   :  { %v237_v24 = vpack.c.bf16 %v223_v21, %v222_v20 }
  0xe1   :  { %v236_v25 = vpack.c.bf16 %v221_v23, %v220_v22  ;;  %v629_v26 = vpop.f32.mrb[4].mxu1 }
  0xe2   :  { %v182_v27 = vadd.f32 %v629_v26, %v539_v11  ;;  %v173_v28 = vpop.f32.mrb[5].mxu1 }
  0xe3   :  { %v174_v29 = vadd.f32 %v539_v11, %v173_v28  ;;  %643 = vmatprep.mubr.msk.bf16.mxu1 %vm267_vm1, %v236_v25  ;;  %v630_v30 = vpop.f32.mrb[6].mxu1 }
  0xe4   :  { %v226_v31 = vmax.f32 %v182_v27, 0.0  ;;  %v185_v32 = vadd.f32 %v630_v30, %v539_v11  ;;  %644 = vmatmul.mubr.msk.bf16.vlgmr.msra.gmra.mrb[16].mxu1 %vm267_vm1, %v237_v24  ;;  %v176_v33 = vpop.f32.mrb[7].mxu1 }
  0xe5   :  { %v224_v34 = vmax.f32 %v174_v29, 0.0  ;;  %v177_v35 = vadd.f32 %v539_v11, %v176_v33 }
  0xe6   :  { %v227_v36 = vmax.f32 %v185_v32, 0.0 }
  0xe7   :  { %v225_v37 = vmax.f32 %v177_v35, 0.0 }
  0xe8   :  { %v239_v38 = vpack.c.bf16 %v227_v36, %v226_v31 }
  0xe9   :  { %v238_v39 = vpack.c.bf16 %v225_v37, %v224_v34  ;;  %v633_v40 = vpop.f32.mrb[8].mxu1 }
  0xea   :  { %v198_v41 = vadd.f32 %v633_v40, %v539_v11  ;;  %v189_v42 = vpop.f32.mrb[9].mxu1 }
  0xeb   :  { %647 = vmatprep.mubr.msk.bf16.mxu1 %vm267_vm1, %v238_v39  ;;  %v190_v43 = vadd.f32 %v539_v11, %v189_v42  ;;  %v634_v44 = vpop.f32.mrb[10].mxu1 }
  0xec   :  { %648 = vmatmul.mubr.msk.bf16.gmra.mrb[20].mxu1 %vm267_vm1, %v239_v38  ;;  %v230_v45 = vmax.f32 %v198_v41, 0.0  ;;  %v201_v46 = vadd.f32 %v634_v44, %v539_v11  ;;  %v192_v47 = vpop.f32.mrb[11].mxu1 }
  0xed   :  { %v228_v48 = vmax.f32 %v190_v43, 0.0  ;;  %v193_v49 = vadd.f32 %v539_v11, %v192_v47 }
  0xee   :  { %v231_v50 = vmax.f32 %v201_v46, 0.0 }
  0xef   :  { %v229_v51 = vmax.f32 %v193_v49, 0.0 }
  0xf0   :  { %v241_v52 = vpack.c.bf16 %v231_v50, %v230_v45 }
  0xf1   :  { %v240_v53 = vpack.c.bf16 %v229_v51, %v228_v48  ;;  %v637_v54 = vpop.f32.mrb[12].mxu1 }
  0xf2   :  { %v214_v55 = vadd.f32 %v637_v54, %v539_v11  ;;  %v205_v56 = vpop.f32.mrb[13].mxu1 }
  0xf3   :  { %651 = vmatprep.mubr.msk.bf16.mxu1 %vm267_vm1, %v240_v53  ;;  %v206_v57 = vadd.f32 %v539_v11, %v205_v56  ;;  %v638_v58 = vpop.f32.mrb[14].mxu1 }
  0xf4   :  { %652 = vmatmul.mubr.msk.bf16.gmra.mrb[24].mxu1 %vm267_vm1, %v241_v52  ;;  %v234_v59 = vmax.f32 %v214_v55, 0.0  ;;  %v217_v60 = vadd.f32 %v638_v58, %v539_v11  ;;  %v208_v61 = vpop.f32.mrb[15].mxu1 }
  0xf5   :  { %v232_v62 = vmax.f32 %v206_v57, 0.0  ;;  %v209_v63 = vadd.f32 %v539_v11, %v208_v61 }
  0xf6   :  { %v235_v0 = vmax.f32 %v217_v60, 0.0 }
  0xf7   :  { %v233_v1 = vmax.f32 %v209_v63, 0.0 }
  0xf8   :  { %v243_v2 = vpack.c.bf16 %v235_v0, %v234_v59 }
  0xf9   :  { %v242_v3 = vpack.c.bf16 %v233_v1, %v232_v62 }
  0xfb   :  { %655 = vmatprep.mubr.msk.bf16.mxu1 %vm267_vm1, %v242_v3  ;;  %v410_v3 = vpop.permute.xlu0 %409 }
  0xfc   :  { %656 = vmatmul.mubr.msk.bf16.gmra.mrb[28].mxu1 %vm267_vm1, %v243_v2  ;;  %v405_v2 = vld [vmem:[%s887_s5] sm:$0xff] }
 0x1b7   :  { %v645_v9 = vpop.f32.mrb[16].mxu1 }
 0x1b8   :  { %v335_v10 = vadd.f32 %v645_v9, %v557_v8  ;;  %v326_v11 = vpop.f32.mrb[17].mxu1 }
 0x1b9   :  { %v327_v12 = vadd.f32 %v557_v8, %v326_v11  ;;  %v646_v13 = vpop.f32.mrb[18].mxu1 }
 0x1ba   :  { %v338_v14 = vadd.f32 %v646_v13, %v557_v8  ;;  %v329_v15 = vpop.f32.mrb[19].mxu1  ;;  %v391_v17 = vmax.f32 %v335_v10, 0.0 }
 0x1bb   :  { %v330_v16 = vadd.f32 %v557_v8, %v329_v15  ;;  %v389_v19 = vmax.f32 %v327_v12, 0.0 }
 0x1bc   :  { %v392_v18 = vmax.f32 %v338_v14, 0.0 }
 0x1bd   :  { %v390_v20 = vmax.f32 %v330_v16, 0.0 }
 0x1be   :  { %v699_v21 = vpack.c.bf16 %v392_v18, %v391_v17 }
 0x1bf   :  { %v695_v23 = vpack.c.bf16 %v390_v20, %v389_v19  ;;  %v649_v24 = vpop.f32.mrb[20].mxu1 }
 0x1c0   :  { %v351_v25 = vadd.f32 %v649_v24, %v557_v8  ;;  %v342_v26 = vpop.f32.mrb[21].mxu1 }
 0x1c1   :  { %v343_v27 = vadd.f32 %v557_v8, %v342_v26  ;;  %697 = vmatpush3.bf16.xpose.msk.msra.mxu0 %vm847_vm4, %v695_v23  ;;  %v650_v28 = vpop.f32.mrb[22].mxu1 }
 0x1c2   :  { %v395_v29 = vmax.f32 %v351_v25, 0.0  ;;  %v354_v30 = vadd.f32 %v650_v28, %v557_v8  ;;  %v345_v31 = vpop.f32.mrb[23].mxu1  ;;  %698 = vmatprep.subr.bf16.mxu0 %v742_v4 }
 0x1c3   :  { %v393_v32 = vmax.f32 %v343_v27, 0.0  ;;  %v346_v33 = vadd.f32 %v557_v8, %v345_v31 }
 0x1c4   :  { %v396_v34 = vmax.f32 %v354_v30, 0.0 }
 0x1c5   :  { %v394_v35 = vmax.f32 %v346_v33, 0.0 }
 0x1c6   :  { %v707_v36 = vpack.c.bf16 %v396_v34, %v395_v29 }
 0x1c7   :  { %v703_v37 = vpack.c.bf16 %v394_v35, %v393_v32  ;;  %v653_v38 = vpop.f32.mrb[24].mxu1 }
 0x1c8   :  { %v367_v39 = vadd.f32 %v653_v38, %v557_v8  ;;  %v358_v40 = vpop.f32.mrb[25].mxu1 }
 0x1c9   :  { %701 = vmatpush3.bf16.xpose.msk.msra.mxu0 %vm847_vm4, %v699_v21  ;;  %v359_v41 = vadd.f32 %v557_v8, %v358_v40  ;;  %v654_v42 = vpop.f32.mrb[26].mxu1 }
 0x1ca   :  { %v399_v43 = vmax.f32 %v367_v39, 0.0  ;;  %702 = vmatprep.subr.bf16.mxu0 %v742_v4  ;;  %v370_v44 = vadd.f32 %v654_v42, %v557_v8  ;;  %v361_v45 = vpop.f32.mrb[27].mxu1 }
 0x1cb   :  { %v397_v46 = vmax.f32 %v359_v41, 0.0  ;;  %v362_v47 = vadd.f32 %v557_v8, %v361_v45 }
 0x1cc   :  { %v400_v48 = vmax.f32 %v370_v44, 0.0 }
 0x1cd   :  { %v398_v49 = vmax.f32 %v362_v47, 0.0 }
 0x1ce   :  { %v715_v50 = vpack.c.bf16 %v400_v48, %v399_v43 }
 0x1cf   :  { %v711_v51 = vpack.c.bf16 %v398_v49, %v397_v46  ;;  %v657_v52 = vpop.f32.mrb[28].mxu1 }
 0x1d0   :  { %v383_v53 = vadd.f32 %v657_v52, %v557_v8  ;;  %v374_v54 = vpop.f32.mrb[29].mxu1 }
 0x1d1   :  { %705 = vmatpush3.bf16.xpose.msk.msra.mxu0 %vm847_vm4, %v703_v37  ;;  %v375_v55 = vadd.f32 %v557_v8, %v374_v54  ;;  %v658_v56 = vpop.f32.mrb[30].mxu1 }
 0x1d2   :  { %706 = vmatprep.subr.bf16.mxu0 %v742_v4  ;;  %v403_v57 = vmax.f32 %v383_v53, 0.0  ;;  %v386_v58 = vadd.f32 %v658_v56, %v557_v8  ;;  %v377_v59 = vpop.f32.mrb[31].mxu1 }
 0x1d3   :  { %v401_v60 = vmax.f32 %v375_v55, 0.0  ;;  %v378_v61 = vadd.f32 %v557_v8, %v377_v59 }
 0x1d4   :  { %v404_v62 = vmax.f32 %v386_v58, 0.0 }
 0x1d5   :  { %v402_v63 = vmax.f32 %v378_v61, 0.0 }
 0x1d6   :  { %v723_v0 = vpack.c.bf16 %v404_v62, %v403_v57 }
 0x1d7   :  { %v719_v1 = vpack.c.bf16 %v402_v63, %v401_v60 }
 0x1d9   :  { %709 = vmatpush3.bf16.xpose.msk.msra.mxu0 %vm847_vm4, %v707_v36 }
 0x1da   :  { %710 = vmatprep.subr.bf16.mxu0 %v742_v4 }
 0x1e1   :  { %713 = vmatpush3.bf16.xpose.msk.msra.mxu0 %vm847_vm4, %v711_v51 }
 0x1e2   :  { %714 = vmatprep.subr.bf16.mxu0 %v742_v4 }
 0x1e9   :  { %717 = vmatpush3.bf16.xpose.msk.msra.mxu0 %vm847_vm4, %v715_v50 }
 0x1ea   :  { %718 = vmatprep.subr.bf16.mxu0 %v742_v4 }
 0x1f1   :  { %721 = vmatpush3.bf16.xpose.msk.msra.mxu0 %vm847_vm4, %v719_v1 }
 0x1f2   :  { %722 = vmatprep.subr.bf16.mxu0 %v742_v4 }
 0x1f9   :  { %725 = vmatpush3.bf16.xpose.msk.msra.mxu0 %vm847_vm4, %v723_v0 }
 0x200   :  { %692 = vmatmul.mubr.msk.f32.vlgmr.msra.gmra.mrb[0].mxu0 %vm412_vm3, %v405_v2 }
 0x2d3   :  { %v530_v5 = vpop.f32.mrb[0].mxu0 }
 0x2d4   :  { %v531_v6 = vadd.f32 %v530_v5, %v410_v3  ;;  %v693_v7 = vpop.f32.mrb[1].mxu0 }
 0x2d6   :  { %534 = vst [vmem:[%s888_s7] sm:$0xff] %v531_v6 }

</bundles_post_ra>
